<compile_context>
chip_gen: v7x
topology: tpu7x:2x2x1
jax: 0.10.0
libtpu: 0.0.40
codegen_flags: <defaults>
</compile_context>

<pallas_src>
import functools

import numpy as np
import jax
import jax.numpy as jnp
from jax.experimental import pallas as pl
from jax.experimental.pallas import tpu as pltpu


# ------------------------------ fused Pallas kernel ------------------------------

def _fused_kernel(x_ref, pw_ref, w_ref, m_ref, b_ref, o_ref, flat_ref):
    """One grid step = one batch image: 2x2 mean pool + 'same' conv, fused.

    x_ref   : (1, Cin, H*W)      NCHW image, spatial dims flattened (free reshape)
    pw_ref  : (W, Wp)            0.25-valued pooling matrix (pools W; H pooled by an add)
    w_ref   : (k*k, Cout, Cin)   conv weight slices, w_ref[dy*k+dx] == weight[:, :, dy, dx]
    m_ref   : (k, 1, Hp*Wp)      per-dx lane masks (1.0 valid / 0.0 where the W tap
                                 would cross the left/right image border)
    b_ref   : (Cout, 1)          bias
    o_ref   : (1, Cout, Hp*Wp)   NCHW-contiguous output block
    flat_ref: (Cin, pad + (Hp+2*pad)*Wp + pad) VMEM scratch holding the zero-padded
              pooled activation, flattened as lane = pad + r*Wp + c (r = padded row).
    """
    w = pw_ref.shape[0]
    wp = pw_ref.shape[1]
    k = m_ref.shape[0]
    pad = (k - 1) // 2
    cout = w_ref.shape[1]
    lanes = o_ref.shape[2]          # Hp * Wp
    hp = lanes // wp
    cdt = flat_ref.dtype            # compute dtype for the MXU operands

    # ---- zero the padded pooled buffer (provides the H-border / corner zeros) ----
    flat_ref[...] = jnp.zeros_like(flat_ref)

    # ---- fused 2x2 mean pool: one pooled row per (unrolled) iteration ------------
    pw = pw_ref[...]
    for hp_i in range(hp):
        # image rows 2*hp_i and 2*hp_i+1 are 2*W contiguous lanes of the flat image
        base = 2 * hp_i * w
        rowpair = x_ref[0, :, base:base + 2 * w].astype(cdt)          # (Cin, 2W)
        hsum = rowpair[:, :w] + rowpair[:, w:]                        # (Cin, W)  H-pool
        prow = jnp.dot(hsum, pw, preferred_element_type=jnp.float32)  # (Cin, Wp) W-pool
        start = pad + (hp_i + pad) * wp
        flat_ref[:, start:start + wp] = prow.astype(cdt)

    # ---- "same" conv: k*k shifted (Cout,Cin)x(Cin,Hp*Wp) matmuls, f32 accumulation
    # out[co, hp*Wp + x] = b[co] + sum_{dy,dx,ci} W[co,ci,dy,dx] * Ppad[ci, hp+dy, x+dx]
    # Ppad[ci, r, c] sits at flat lane pad + r*Wp + c, so the (dy, dx) tap is the
    # contiguous lane slice [dy*Wp + dx : dy*Wp + dx + Hp*Wp) of flat_ref.
    # (acc is (Cout, Hp*Wp) f32 = 2 KiB here -> registers; use a VMEM scratch at scale.)
    acc = jnp.zeros((cout, lanes), jnp.float32)
    for dy in range(k):
        for dx in range(k):
            s = dy * wp + dx
            patch = flat_ref[:, s:s + lanes]                          # (Cin, Hp*Wp)
            if dx != pad:  # zero lanes whose W tap crosses the image border
                patch = patch * m_ref[dx]
            acc = acc + jnp.dot(w_ref[dy * k + dx], patch,
                                preferred_element_type=jnp.float32)   # (Cout, Hp*Wp)

    o_ref[0] = (acc + b_ref[...]).astype(o_ref.dtype)


# --------------------------------- public wrapper ---------------------------------

def mean_pool_conv(x, weight, bias, *, compute_dtype=jnp.bfloat16):
    """AvgPool2d(2) followed by a stride-1 'same' Conv2d (PyTorch MeanPoolConv).

    x: (N, Cin, H, W) float32 NCHW; weight: (Cout, Cin, k, k); bias: (Cout,).
    Returns (N, Cout, H//2, W//2) float32 NCHW.  Fully jit-able (no host round-trips).
    """
    n, cin, h, w = x.shape
    cout, cin_w, k, k2 = weight.shape
    assert cin_w == cin and k == k2 and k % 2 == 1
    assert h % 2 == 0 and w % 2 == 0
    pad = (k - 1) // 2
    hp, wp = h // 2, w // 2
    lanes = hp * wp
    lflat = 2 * pad + (hp + 2 * pad) * wp

    # --- tiny, jit-friendly operand prep (pure jnp) ---
    x_flat = x.reshape(n, cin, h * w)                                 # metadata-only
    pw = (0.25 * jnp.repeat(jnp.eye(wp, dtype=jnp.float32), 2, axis=1).T
          ).astype(compute_dtype)                                     # (W, Wp)
    w2 = jnp.transpose(weight, (2, 3, 0, 1)).reshape(k * k, cout, cin).astype(compute_dtype)
    wcoord = jnp.arange(lanes, dtype=jnp.int32) % wp
    masks = jnp.stack([(wcoord >= pad - dx) & (wcoord < wp + pad - dx)
                       for dx in range(k)]).astype(compute_dtype).reshape(k, 1, lanes)
    b2 = bias.astype(jnp.float32).reshape(cout, 1)

    out_flat = pl.pallas_call(
        _fused_kernel,
        out_shape=jax.ShapeDtypeStruct((n, cout, lanes), jnp.float32),
        grid=(n,),
        in_specs=[
            pl.BlockSpec((1, cin, h * w), lambda b: (b, 0, 0)),
            pl.BlockSpec((w, wp), lambda b: (0, 0)),
            pl.BlockSpec((k * k, cout, cin), lambda b: (0, 0, 0)),
            pl.BlockSpec((k, 1, lanes), lambda b: (0, 0, 0)),
            pl.BlockSpec((cout, 1), lambda b: (0, 0)),
        ],
        out_specs=pl.BlockSpec((1, cout, lanes), lambda b: (b, 0, 0)),
        scratch_shapes=[pltpu.VMEM((cin, lflat), compute_dtype)],
        compiler_params=pltpu.CompilerParams(dimension_semantics=("parallel",)),
    )(x_flat, pw, w2, masks, b2)

    # (N, Cout, Hp*Wp) is already NCHW-contiguous -> free reshape, no extra HBM pass.
    return out_flat.reshape(n, cout, hp, wp)


# ------------------------------------ reference ------------------------------------

def _reference(x, weight, bias):
    n, c, h, w = x.shape
    pad = (weight.shape[2] - 1) // 2
    pooled = x.reshape(n, c, h // 2, 2, w // 2, 2).mean(axis=(3, 5))
    out = jax.lax.conv_general_dilated(
        pooled, weight, window_strides=(1, 1),
        padding=[(pad, pad), (pad, pad)],
        dimension_numbers=("NCHW", "OIHW", "NCHW"))
    return out + bias[None, :, None, None]


# -------------------------------------- driver --------------------------------------

if __name__ == "__main__":
    N, Cin, H, W = 2, 4, 16, 16
    Cout, K = 8, 3

    key = jax.random.PRNGKey(0)
    kx, kw, kb = jax.random.split(key, 3)
    x = jax.random.normal(kx, (N, Cin, H, W), dtype=jnp.float32)
    weight = 0.1 * jax.random.normal(kw, (Cout, Cin, K, K), dtype=jnp.float32)
    bias = 0.1 * jax.random.normal(kb, (Cout,), dtype=jnp.float32)

    ref = jax.block_until_ready(_reference(x, weight, bias))

    # Strict numerical check: f32 operands, f32 accumulation.
    f32_fn = jax.jit(functools.partial(mean_pool_conv, compute_dtype=jnp.float32))
    out_f32 = jax.block_until_ready(f32_fn(x, weight, bias))
    assert out_f32.shape == (N, Cout, H // 2, W // 2)
    np.testing.assert_allclose(np.asarray(out_f32), np.asarray(ref), atol=1e-3, rtol=1e-3)

    # Production path (review: v5e/v6e/v7x): bf16 MXU operands, f32 accumulation.
    bf16_fn = jax.jit(functools.partial(mean_pool_conv, compute_dtype=jnp.bfloat16))
    out_bf16 = jax.block_until_ready(bf16_fn(x, weight, bias))
    assert out_bf16.shape == (N, Cout, H // 2, W // 2)
    np.testing.assert_allclose(np.asarray(out_bf16), np.asarray(ref), atol=3e-2, rtol=3e-2)

    print("KERNEL_OK")
</pallas_src>

<mosaic_0001>
module attributes {stable_mosaic.version = 11 : i64} {
  func.func @_fused_kernel(%arg0: i32, %arg1: memref<1x4x256xf32, #tpu.memory_space<vmem>>, %arg2: memref<16x8xf32, #tpu.memory_space<vmem>>, %arg3: memref<9x8x4xf32, #tpu.memory_space<vmem>>, %arg4: memref<3x1x64xf32, #tpu.memory_space<vmem>>, %arg5: memref<8x1xf32, #tpu.memory_space<vmem>>, %arg6: memref<1x8x64xf32, #tpu.memory_space<vmem>>, %arg7: memref<4x82xf32, #tpu.memory_space<vmem>>) attributes {dimension_semantics = [#tpu.dimension_semantics<parallel>], iteration_bounds = array<i64: 2>, scalar_prefetch = 0 : i64, scratch_operands = 1 : i64, tpu.core_type = #tpu.core_type<tc>, window_params = [{transform_indices = @transform_0, window_bounds = array<i64: 1, 4, 256>}, {pipeline_mode = #tpu.pipeline_mode<synchronous>, transform_indices = @transform_1, window_bounds = array<i64: 16, 8>}, {pipeline_mode = #tpu.pipeline_mode<synchronous>, transform_indices = @transform_2, window_bounds = array<i64: 9, 8, 4>}, {pipeline_mode = #tpu.pipeline_mode<synchronous>, transform_indices = @transform_3, window_bounds = array<i64: 3, 1, 64>}, {pipeline_mode = #tpu.pipeline_mode<synchronous>, transform_indices = @transform_4, window_bounds = array<i64: 8, 1>}, {transform_indices = @transform_5, window_bounds = array<i64: 1, 8, 64>}]} {
    %cst = arith.constant 0.000000e+00 : f32
    %0 = vector.broadcast %cst : f32 to vector<4x82xf32>
    %c0 = arith.constant 0 : index
    %c0_0 = arith.constant 0 : index
    %1 = vector.load %arg7[%c0, %c0_0] : memref<4x82xf32, #tpu.memory_space<vmem>>, vector<4x82xf32>
    tpu.vector_store %arg7[%c0, %c0_0], %0 {strides = array<i32>} : memref<4x82xf32, #tpu.memory_space<vmem>>, vector<4x82xf32>,
    %c0_1 = arith.constant 0 : index
    %c0_2 = arith.constant 0 : index
    %2 = vector.load %arg2[%c0_1, %c0_2] : memref<16x8xf32, #tpu.memory_space<vmem>>, vector<16x8xf32>
    %c0_3 = arith.constant 0 : index
    %c0_4 = arith.constant 0 : index
    %c0_5 = arith.constant 0 : index
    %3 = vector.load %arg1[%c0_3, %c0_4, %c0_5] : memref<1x4x256xf32, #tpu.memory_space<vmem>>, vector<1x4x32xf32>
    %4 = vector.shape_cast %3 : vector<1x4x32xf32> to vector<4x32xf32>
    %5 = vector.extract_strided_slice %4 {offsets = [0, 0], sizes = [4, 16], strides = [1, 1]} : vector<4x32xf32> to vector<4x16xf32>
    %6 = vector.extract_strided_slice %4 {offsets = [0, 16], sizes = [4, 16], strides = [1, 1]} : vector<4x32xf32> to vector<4x16xf32>
    %7 = arith.addf %5, %6 : vector<4x16xf32>
    %cst_6 = arith.constant dense<0.000000e+00> : vector<4x8xf32>
    %8 = tpu.matmul %7, %2, %cst_6 {dimension_numbers = #tpu.dot_dimension_numbers<[1], [0], [0], [1], [0, 0, 1, 1], [], []>} : vector<4x16xf32>, vector<16x8xf32>, vector<4x8xf32> -> vector<4x8xf32>
    %c0_7 = arith.constant 0 : index
    %c9 = arith.constant 9 : index
    %9 = vector.load %arg7[%c0_7, %c9] : memref<4x82xf32, #tpu.memory_space<vmem>>, vector<4x8xf32>
    tpu.vector_store %arg7[%c0_7, %c9], %8 {strides = array<i32>} : memref<4x82xf32, #tpu.memory_space<vmem>>, vector<4x8xf32>,
    %c0_8 = arith.constant 0 : index
    %c0_9 = arith.constant 0 : index
    %c32 = arith.constant 32 : index
    %10 = vector.load %arg1[%c0_8, %c0_9, %c32] : memref<1x4x256xf32, #tpu.memory_space<vmem>>, vector<1x4x32xf32>
    %11 = vector.shape_cast %10 : vector<1x4x32xf32> to vector<4x32xf32>
    %12 = vector.extract_strided_slice %11 {offsets = [0, 0], sizes = [4, 16], strides = [1, 1]} : vector<4x32xf32> to vector<4x16xf32>
    %13 = vector.extract_strided_slice %11 {offsets = [0, 16], sizes = [4, 16], strides = [1, 1]} : vector<4x32xf32> to vector<4x16xf32>
    %14 = arith.addf %12, %13 : vector<4x16xf32>
    %cst_10 = arith.constant dense<0.000000e+00> : vector<4x8xf32>
    %15 = tpu.matmul %14, %2, %cst_10 {dimension_numbers = #tpu.dot_dimension_numbers<[1], [0], [0], [1], [0, 0, 1, 1], [], []>} : vector<4x16xf32>, vector<16x8xf32>, vector<4x8xf32> -> vector<4x8xf32>
    %c0_11 = arith.constant 0 : index
    %c17 = arith.constant 17 : index
    %16 = vector.load %arg7[%c0_11, %c17] : memref<4x82xf32, #tpu.memory_space<vmem>>, vector<4x8xf32>
    tpu.vector_store %arg7[%c0_11, %c17], %15 {strides = array<i32>} : memref<4x82xf32, #tpu.memory_space<vmem>>, vector<4x8xf32>,
    %c0_12 = arith.constant 0 : index
    %c0_13 = arith.constant 0 : index
    %c64 = arith.constant 64 : index
    %17 = vector.load %arg1[%c0_12, %c0_13, %c64] : memref<1x4x256xf32, #tpu.memory_space<vmem>>, vector<1x4x32xf32>
    %18 = vector.shape_cast %17 : vector<1x4x32xf32> to vector<4x32xf32>
    %19 = vector.extract_strided_slice %18 {offsets = [0, 0], sizes = [4, 16], strides = [1, 1]} : vector<4x32xf32> to vector<4x16xf32>
    %20 = vector.extract_strided_slice %18 {offsets = [0, 16], sizes = [4, 16], strides = [1, 1]} : vector<4x32xf32> to vector<4x16xf32>
    %21 = arith.addf %19, %20 : vector<4x16xf32>
    %cst_14 = arith.constant dense<0.000000e+00> : vector<4x8xf32>
    %22 = tpu.matmul %21, %2, %cst_14 {dimension_numbers = #tpu.dot_dimension_numbers<[1], [0], [0], [1], [0, 0, 1, 1], [], []>} : vector<4x16xf32>, vector<16x8xf32>, vector<4x8xf32> -> vector<4x8xf32>
    %c0_15 = arith.constant 0 : index
    %c25 = arith.constant 25 : index
    %23 = vector.load %arg7[%c0_15, %c25] : memref<4x82xf32, #tpu.memory_space<vmem>>, vector<4x8xf32>
    tpu.vector_store %arg7[%c0_15, %c25], %22 {strides = array<i32>} : memref<4x82xf32, #tpu.memory_space<vmem>>, vector<4x8xf32>,
    %c0_16 = arith.constant 0 : index
    %c0_17 = arith.constant 0 : index
    %c96 = arith.constant 96 : index
    %24 = vector.load %arg1[%c0_16, %c0_17, %c96] : memref<1x4x256xf32, #tpu.memory_space<vmem>>, vector<1x4x32xf32>
    %25 = vector.shape_cast %24 : vector<1x4x32xf32> to vector<4x32xf32>
    %26 = vector.extract_strided_slice %25 {offsets = [0, 0], sizes = [4, 16], strides = [1, 1]} : vector<4x32xf32> to vector<4x16xf32>
    %27 = vector.extract_strided_slice %25 {offsets = [0, 16], sizes = [4, 16], strides = [1, 1]} : vector<4x32xf32> to vector<4x16xf32>
    %28 = arith.addf %26, %27 : vector<4x16xf32>
    %cst_18 = arith.constant dense<0.000000e+00> : vector<4x8xf32>
    %29 = tpu.matmul %28, %2, %cst_18 {dimension_numbers = #tpu.dot_dimension_numbers<[1], [0], [0], [1], [0, 0, 1, 1], [], []>} : vector<4x16xf32>, vector<16x8xf32>, vector<4x8xf32> -> vector<4x8xf32>
    %c0_19 = arith.constant 0 : index
    %c33 = arith.constant 33 : index
    %30 = vector.load %arg7[%c0_19, %c33] : memref<4x82xf32, #tpu.memory_space<vmem>>, vector<4x8xf32>
    tpu.vector_store %arg7[%c0_19, %c33], %29 {strides = array<i32>} : memref<4x82xf32, #tpu.memory_space<vmem>>, vector<4x8xf32>,
    %c0_20 = arith.constant 0 : index
    %c0_21 = arith.constant 0 : index
    %c128 = arith.constant 128 : index
    %31 = vector.load %arg1[%c0_20, %c0_21, %c128] : memref<1x4x256xf32, #tpu.memory_space<vmem>>, vector<1x4x32xf32>
    %32 = vector.shape_cast %31 : vector<1x4x32xf32> to vector<4x32xf32>
    %33 = vector.extract_strided_slice %32 {offsets = [0, 0], sizes = [4, 16], strides = [1, 1]} : vector<4x32xf32> to vector<4x16xf32>
    %34 = vector.extract_strided_slice %32 {offsets = [0, 16], sizes = [4, 16], strides = [1, 1]} : vector<4x32xf32> to vector<4x16xf32>
    %35 = arith.addf %33, %34 : vector<4x16xf32>
    %cst_22 = arith.constant dense<0.000000e+00> : vector<4x8xf32>
    %36 = tpu.matmul %35, %2, %cst_22 {dimension_numbers = #tpu.dot_dimension_numbers<[1], [0], [0], [1], [0, 0, 1, 1], [], []>} : vector<4x16xf32>, vector<16x8xf32>, vector<4x8xf32> -> vector<4x8xf32>
    %c0_23 = arith.constant 0 : index
    %c41 = arith.constant 41 : index
    %37 = vector.load %arg7[%c0_23, %c41] : memref<4x82xf32, #tpu.memory_space<vmem>>, vector<4x8xf32>
    tpu.vector_store %arg7[%c0_23, %c41], %36 {strides = array<i32>} : memref<4x82xf32, #tpu.memory_space<vmem>>, vector<4x8xf32>,
    %c0_24 = arith.constant 0 : index
    %c0_25 = arith.constant 0 : index
    %c160 = arith.constant 160 : index
    %38 = vector.load %arg1[%c0_24, %c0_25, %c160] : memref<1x4x256xf32, #tpu.memory_space<vmem>>, vector<1x4x32xf32>
    %39 = vector.shape_cast %38 : vector<1x4x32xf32> to vector<4x32xf32>
    %40 = vector.extract_strided_slice %39 {offsets = [0, 0], sizes = [4, 16], strides = [1, 1]} : vector<4x32xf32> to vector<4x16xf32>
    %41 = vector.extract_strided_slice %39 {offsets = [0, 16], sizes = [4, 16], strides = [1, 1]} : vector<4x32xf32> to vector<4x16xf32>
    %42 = arith.addf %40, %41 : vector<4x16xf32>
    %cst_26 = arith.constant dense<0.000000e+00> : vector<4x8xf32>
    %43 = tpu.matmul %42, %2, %cst_26 {dimension_numbers = #tpu.dot_dimension_numbers<[1], [0], [0], [1], [0, 0, 1, 1], [], []>} : vector<4x16xf32>, vector<16x8xf32>, vector<4x8xf32> -> vector<4x8xf32>
    %c0_27 = arith.constant 0 : index
    %c49 = arith.constant 49 : index
    %44 = vector.load %arg7[%c0_27, %c49] : memref<4x82xf32, #tpu.memory_space<vmem>>, vector<4x8xf32>
    tpu.vector_store %arg7[%c0_27, %c49], %43 {strides = array<i32>} : memref<4x82xf32, #tpu.memory_space<vmem>>, vector<4x8xf32>,
    %c0_28 = arith.constant 0 : index
    %c0_29 = arith.constant 0 : index
    %c192 = arith.constant 192 : index
    %45 = vector.load %arg1[%c0_28, %c0_29, %c192] : memref<1x4x256xf32, #tpu.memory_space<vmem>>, vector<1x4x32xf32>
    %46 = vector.shape_cast %45 : vector<1x4x32xf32> to vector<4x32xf32>
    %47 = vector.extract_strided_slice %46 {offsets = [0, 0], sizes = [4, 16], strides = [1, 1]} : vector<4x32xf32> to vector<4x16xf32>
    %48 = vector.extract_strided_slice %46 {offsets = [0, 16], sizes = [4, 16], strides = [1, 1]} : vector<4x32xf32> to vector<4x16xf32>
    %49 = arith.addf %47, %48 : vector<4x16xf32>
    %cst_30 = arith.constant dense<0.000000e+00> : vector<4x8xf32>
    %50 = tpu.matmul %49, %2, %cst_30 {dimension_numbers = #tpu.dot_dimension_numbers<[1], [0], [0], [1], [0, 0, 1, 1], [], []>} : vector<4x16xf32>, vector<16x8xf32>, vector<4x8xf32> -> vector<4x8xf32>
    %c0_31 = arith.constant 0 : index
    %c57 = arith.constant 57 : index
    %51 = vector.load %arg7[%c0_31, %c57] : memref<4x82xf32, #tpu.memory_space<vmem>>, vector<4x8xf32>
    tpu.vector_store %arg7[%c0_31, %c57], %50 {strides = array<i32>} : memref<4x82xf32, #tpu.memory_space<vmem>>, vector<4x8xf32>,
    %c0_32 = arith.constant 0 : index
    %c0_33 = arith.constant 0 : index
    %c224 = arith.constant 224 : index
    %52 = vector.load %arg1[%c0_32, %c0_33, %c224] : memref<1x4x256xf32, #tpu.memory_space<vmem>>, vector<1x4x32xf32>
    %53 = vector.shape_cast %52 : vector<1x4x32xf32> to vector<4x32xf32>
    %54 = vector.extract_strided_slice %53 {offsets = [0, 0], sizes = [4, 16], strides = [1, 1]} : vector<4x32xf32> to vector<4x16xf32>
    %55 = vector.extract_strided_slice %53 {offsets = [0, 16], sizes = [4, 16], strides = [1, 1]} : vector<4x32xf32> to vector<4x16xf32>
    %56 = arith.addf %54, %55 : vector<4x16xf32>
    %cst_34 = arith.constant dense<0.000000e+00> : vector<4x8xf32>
    %57 = tpu.matmul %56, %2, %cst_34 {dimension_numbers = #tpu.dot_dimension_numbers<[1], [0], [0], [1], [0, 0, 1, 1], [], []>} : vector<4x16xf32>, vector<16x8xf32>, vector<4x8xf32> -> vector<4x8xf32>
    %c0_35 = arith.constant 0 : index
    %c65 = arith.constant 65 : index
    %58 = vector.load %arg7[%c0_35, %c65] : memref<4x82xf32, #tpu.memory_space<vmem>>, vector<4x8xf32>
    tpu.vector_store %arg7[%c0_35, %c65], %57 {strides = array<i32>} : memref<4x82xf32, #tpu.memory_space<vmem>>, vector<4x8xf32>,
    %cst_36 = arith.constant 0.000000e+00 : f32
    %59 = vector.broadcast %cst_36 : f32 to vector<8x64xf32>
    %c0_37 = arith.constant 0 : index
    %c0_38 = arith.constant 0 : index
    %60 = vector.load %arg7[%c0_37, %c0_38] : memref<4x82xf32, #tpu.memory_space<vmem>>, vector<4x64xf32>
    %c0_39 = arith.constant 0 : index
    %c0_40 = arith.constant 0 : index
    %c0_41 = arith.constant 0 : index
    %61 = vector.load %arg4[%c0_39, %c0_40, %c0_41] : memref<3x1x64xf32, #tpu.memory_space<vmem>>, vector<1x1x64xf32>
    %62 = vector.shape_cast %61 : vector<1x1x64xf32> to vector<1x64xf32>
    %63 = vector.broadcast %62 : vector<1x64xf32> to vector<4x64xf32>
    %64 = arith.mulf %60, %63 : vector<4x64xf32>
    %c0_42 = arith.constant 0 : index
    %c0_43 = arith.constant 0 : index
    %c0_44 = arith.constant 0 : index
    %65 = vector.load %arg3[%c0_42, %c0_43, %c0_44] : memref<9x8x4xf32, #tpu.memory_space<vmem>>, vector<1x8x4xf32>
    %66 = vector.shape_cast %65 : vector<1x8x4xf32> to vector<8x4xf32>
    %cst_45 = arith.constant dense<0.000000e+00> : vector<8x64xf32>
    %67 = tpu.matmul %66, %64, %cst_45 {dimension_numbers = #tpu.dot_dimension_numbers<[1], [0], [0], [1], [0, 0, 1, 1], [], []>} : vector<8x4xf32>, vector<4x64xf32>, vector<8x64xf32> -> vector<8x64xf32>
    %68 = arith.addf %59, %67 : vector<8x64xf32>
    %c0_46 = arith.constant 0 : index
    %c1 = arith.constant 1 : index
    %69 = vector.load %arg7[%c0_46, %c1] : memref<4x82xf32, #tpu.memory_space<vmem>>, vector<4x64xf32>
    %c1_47 = arith.constant 1 : index
    %c0_48 = arith.constant 0 : index
    %c0_49 = arith.constant 0 : index
    %70 = vector.load %arg3[%c1_47, %c0_48, %c0_49] : memref<9x8x4xf32, #tpu.memory_space<vmem>>, vector<1x8x4xf32>
    %71 = vector.shape_cast %70 : vector<1x8x4xf32> to vector<8x4xf32>
    %cst_50 = arith.constant dense<0.000000e+00> : vector<8x64xf32>
    %72 = tpu.matmul %71, %69, %cst_50 {dimension_numbers = #tpu.dot_dimension_numbers<[1], [0], [0], [1], [0, 0, 1, 1], [], []>} : vector<8x4xf32>, vector<4x64xf32>, vector<8x64xf32> -> vector<8x64xf32>
    %73 = arith.addf %68, %72 : vector<8x64xf32>
    %c0_51 = arith.constant 0 : index
    %c2 = arith.constant 2 : index
    %74 = vector.load %arg7[%c0_51, %c2] : memref<4x82xf32, #tpu.memory_space<vmem>>, vector<4x64xf32>
    %c2_52 = arith.constant 2 : index
    %c0_53 = arith.constant 0 : index
    %c0_54 = arith.constant 0 : index
    %75 = vector.load %arg4[%c2_52, %c0_53, %c0_54] : memref<3x1x64xf32, #tpu.memory_space<vmem>>, vector<1x1x64xf32>
    %76 = vector.shape_cast %75 : vector<1x1x64xf32> to vector<1x64xf32>
    %77 = vector.broadcast %76 : vector<1x64xf32> to vector<4x64xf32>
    %78 = arith.mulf %74, %77 : vector<4x64xf32>
    %c2_55 = arith.constant 2 : index
    %c0_56 = arith.constant 0 : index
    %c0_57 = arith.constant 0 : index
    %79 = vector.load %arg3[%c2_55, %c0_56, %c0_57] : memref<9x8x4xf32, #tpu.memory_space<vmem>>, vector<1x8x4xf32>
    %80 = vector.shape_cast %79 : vector<1x8x4xf32> to vector<8x4xf32>
    %cst_58 = arith.constant dense<0.000000e+00> : vector<8x64xf32>
    %81 = tpu.matmul %80, %78, %cst_58 {dimension_numbers = #tpu.dot_dimension_numbers<[1], [0], [0], [1], [0, 0, 1, 1], [], []>} : vector<8x4xf32>, vector<4x64xf32>, vector<8x64xf32> -> vector<8x64xf32>
    %82 = arith.addf %73, %81 : vector<8x64xf32>
    %c0_59 = arith.constant 0 : index
    %c8 = arith.constant 8 : index
    %83 = vector.load %arg7[%c0_59, %c8] : memref<4x82xf32, #tpu.memory_space<vmem>>, vector<4x64xf32>
    %c0_60 = arith.constant 0 : index
    %c0_61 = arith.constant 0 : index
    %c0_62 = arith.constant 0 : index
    %84 = vector.load %arg4[%c0_60, %c0_61, %c0_62] : memref<3x1x64xf32, #tpu.memory_space<vmem>>, vector<1x1x64xf32>
    %85 = vector.shape_cast %84 : vector<1x1x64xf32> to vector<1x64xf32>
    %86 = vector.broadcast %85 : vector<1x64xf32> to vector<4x64xf32>
    %87 = arith.mulf %83, %86 : vector<4x64xf32>
    %c3 = arith.constant 3 : index
    %c0_63 = arith.constant 0 : index
    %c0_64 = arith.constant 0 : index
    %88 = vector.load %arg3[%c3, %c0_63, %c0_64] : memref<9x8x4xf32, #tpu.memory_space<vmem>>, vector<1x8x4xf32>
    %89 = vector.shape_cast %88 : vector<1x8x4xf32> to vector<8x4xf32>
    %cst_65 = arith.constant dense<0.000000e+00> : vector<8x64xf32>
    %90 = tpu.matmul %89, %87, %cst_65 {dimension_numbers = #tpu.dot_dimension_numbers<[1], [0], [0], [1], [0, 0, 1, 1], [], []>} : vector<8x4xf32>, vector<4x64xf32>, vector<8x64xf32> -> vector<8x64xf32>
    %91 = arith.addf %82, %90 : vector<8x64xf32>
    %c0_66 = arith.constant 0 : index
    %c9_67 = arith.constant 9 : index
    %92 = vector.load %arg7[%c0_66, %c9_67] : memref<4x82xf32, #tpu.memory_space<vmem>>, vector<4x64xf32>
    %c4 = arith.constant 4 : index
    %c0_68 = arith.constant 0 : index
    %c0_69 = arith.constant 0 : index
    %93 = vector.load %arg3[%c4, %c0_68, %c0_69] : memref<9x8x4xf32, #tpu.memory_space<vmem>>, vector<1x8x4xf32>
    %94 = vector.shape_cast %93 : vector<1x8x4xf32> to vector<8x4xf32>
    %cst_70 = arith.constant dense<0.000000e+00> : vector<8x64xf32>
    %95 = tpu.matmul %94, %92, %cst_70 {dimension_numbers = #tpu.dot_dimension_numbers<[1], [0], [0], [1], [0, 0, 1, 1], [], []>} : vector<8x4xf32>, vector<4x64xf32>, vector<8x64xf32> -> vector<8x64xf32>
    %96 = arith.addf %91, %95 : vector<8x64xf32>
    %c0_71 = arith.constant 0 : index
    %c10 = arith.constant 10 : index
    %97 = vector.load %arg7[%c0_71, %c10] : memref<4x82xf32, #tpu.memory_space<vmem>>, vector<4x64xf32>
    %c2_72 = arith.constant 2 : index
    %c0_73 = arith.constant 0 : index
    %c0_74 = arith.constant 0 : index
    %98 = vector.load %arg4[%c2_72, %c0_73, %c0_74] : memref<3x1x64xf32, #tpu.memory_space<vmem>>, vector<1x1x64xf32>
    %99 = vector.shape_cast %98 : vector<1x1x64xf32> to vector<1x64xf32>
    %100 = vector.broadcast %99 : vector<1x64xf32> to vector<4x64xf32>
    %101 = arith.mulf %97, %100 : vector<4x64xf32>
    %c5 = arith.constant 5 : index
    %c0_75 = arith.constant 0 : index
    %c0_76 = arith.constant 0 : index
    %102 = vector.load %arg3[%c5, %c0_75, %c0_76] : memref<9x8x4xf32, #tpu.memory_space<vmem>>, vector<1x8x4xf32>
    %103 = vector.shape_cast %102 : vector<1x8x4xf32> to vector<8x4xf32>
    %cst_77 = arith.constant dense<0.000000e+00> : vector<8x64xf32>
    %104 = tpu.matmul %103, %101, %cst_77 {dimension_numbers = #tpu.dot_dimension_numbers<[1], [0], [0], [1], [0, 0, 1, 1], [], []>} : vector<8x4xf32>, vector<4x64xf32>, vector<8x64xf32> -> vector<8x64xf32>
    %105 = arith.addf %96, %104 : vector<8x64xf32>
    %c0_78 = arith.constant 0 : index
    %c16 = arith.constant 16 : index
    %106 = vector.load %arg7[%c0_78, %c16] : memref<4x82xf32, #tpu.memory_space<vmem>>, vector<4x64xf32>
    %c0_79 = arith.constant 0 : index
    %c0_80 = arith.constant 0 : index
    %c0_81 = arith.constant 0 : index
    %107 = vector.load %arg4[%c0_79, %c0_80, %c0_81] : memref<3x1x64xf32, #tpu.memory_space<vmem>>, vector<1x1x64xf32>
    %108 = vector.shape_cast %107 : vector<1x1x64xf32> to vector<1x64xf32>
    %109 = vector.broadcast %108 : vector<1x64xf32> to vector<4x64xf32>
    %110 = arith.mulf %106, %109 : vector<4x64xf32>
    %c6 = arith.constant 6 : index
    %c0_82 = arith.constant 0 : index
    %c0_83 = arith.constant 0 : index
    %111 = vector.load %arg3[%c6, %c0_82, %c0_83] : memref<9x8x4xf32, #tpu.memory_space<vmem>>, vector<1x8x4xf32>
    %112 = vector.shape_cast %111 : vector<1x8x4xf32> to vector<8x4xf32>
    %cst_84 = arith.constant dense<0.000000e+00> : vector<8x64xf32>
    %113 = tpu.matmul %112, %110, %cst_84 {dimension_numbers = #tpu.dot_dimension_numbers<[1], [0], [0], [1], [0, 0, 1, 1], [], []>} : vector<8x4xf32>, vector<4x64xf32>, vector<8x64xf32> -> vector<8x64xf32>
    %114 = arith.addf %105, %113 : vector<8x64xf32>
    %c0_85 = arith.constant 0 : index
    %c17_86 = arith.constant 17 : index
    %115 = vector.load %arg7[%c0_85, %c17_86] : memref<4x82xf32, #tpu.memory_space<vmem>>, vector<4x64xf32>
    %c7 = arith.constant 7 : index
    %c0_87 = arith.constant 0 : index
    %c0_88 = arith.constant 0 : index
    %116 = vector.load %arg3[%c7, %c0_87, %c0_88] : memref<9x8x4xf32, #tpu.memory_space<vmem>>, vector<1x8x4xf32>
    %117 = vector.shape_cast %116 : vector<1x8x4xf32> to vector<8x4xf32>
    %cst_89 = arith.constant dense<0.000000e+00> : vector<8x64xf32>
    %118 = tpu.matmul %117, %115, %cst_89 {dimension_numbers = #tpu.dot_dimension_numbers<[1], [0], [0], [1], [0, 0, 1, 1], [], []>} : vector<8x4xf32>, vector<4x64xf32>, vector<8x64xf32> -> vector<8x64xf32>
    %119 = arith.addf %114, %118 : vector<8x64xf32>
    %c0_90 = arith.constant 0 : index
    %c18 = arith.constant 18 : index
    %120 = vector.load %arg7[%c0_90, %c18] : memref<4x82xf32, #tpu.memory_space<vmem>>, vector<4x64xf32>
    %c2_91 = arith.constant 2 : index
    %c0_92 = arith.constant 0 : index
    %c0_93 = arith.constant 0 : index
    %121 = vector.load %arg4[%c2_91, %c0_92, %c0_93] : memref<3x1x64xf32, #tpu.memory_space<vmem>>, vector<1x1x64xf32>
    %122 = vector.shape_cast %121 : vector<1x1x64xf32> to vector<1x64xf32>
    %123 = vector.broadcast %122 : vector<1x64xf32> to vector<4x64xf32>
    %124 = arith.mulf %120, %123 : vector<4x64xf32>
    %c8_94 = arith.constant 8 : index
    %c0_95 = arith.constant 0 : index
    %c0_96 = arith.constant 0 : index
    %125 = vector.load %arg3[%c8_94, %c0_95, %c0_96] : memref<9x8x4xf32, #tpu.memory_space<vmem>>, vector<1x8x4xf32>
    %126 = vector.shape_cast %125 : vector<1x8x4xf32> to vector<8x4xf32>
    %cst_97 = arith.constant dense<0.000000e+00> : vector<8x64xf32>
    %127 = tpu.matmul %126, %124, %cst_97 {dimension_numbers = #tpu.dot_dimension_numbers<[1], [0], [0], [1], [0, 0, 1, 1], [], []>} : vector<8x4xf32>, vector<4x64xf32>, vector<8x64xf32> -> vector<8x64xf32>
    %128 = arith.addf %119, %127 : vector<8x64xf32>
    %c0_98 = arith.constant 0 : index
    %c0_99 = arith.constant 0 : index
    %129 = vector.load %arg5[%c0_98, %c0_99] : memref<8x1xf32, #tpu.memory_space<vmem>>, vector<8x1xf32>
    %130 = vector.broadcast %129 : vector<8x1xf32> to vector<8x64xf32>
    %131 = arith.addf %128, %130 : vector<8x64xf32>
    %c0_100 = arith.constant 0 : index
    %c0_101 = arith.constant 0 : index
    %c0_102 = arith.constant 0 : index
    %132 = vector.load %arg6[%c0_100, %c0_101, %c0_102] : memref<1x8x64xf32, #tpu.memory_space<vmem>>, vector<1x8x64xf32>
    %133 = vector.shape_cast %132 : vector<1x8x64xf32> to vector<8x64xf32>
    %134 = vector.shape_cast %131 : vector<8x64xf32> to vector<1x8x64xf32>
    tpu.vector_store %arg6[%c0_100, %c0_101, %c0_102], %134 {strides = array<i32>} : memref<1x8x64xf32, #tpu.memory_space<vmem>>, vector<1x8x64xf32>,
    return
  }
  func.func @transform_0(%arg0: i32) -> (i32, i32, i32) {
    %c0_i32 = arith.constant 0 : i32
    %c0_i32_0 = arith.constant 0 : i32
    %c0_i32_1 = arith.constant 0 : i32
    return %arg0, %c0_i32, %c0_i32_0 : i32, i32, i32
  }
  func.func @transform_1(%arg0: i32) -> (i32, i32) {
    %c0_i32 = arith.constant 0 : i32
    %c0_i32_0 = arith.constant 0 : i32
    %c0_i32_1 = arith.constant 0 : i32
    return %c0_i32, %c0_i32_0 : i32, i32
  }
  func.func @transform_2(%arg0: i32) -> (i32, i32, i32) {
    %c0_i32 = arith.constant 0 : i32
    %c0_i32_0 = arith.constant 0 : i32
    %c0_i32_1 = arith.constant 0 : i32
    %c0_i32_2 = arith.constant 0 : i32
    return %c0_i32, %c0_i32_0, %c0_i32_1 : i32, i32, i32
  }
  func.func @transform_3(%arg0: i32) -> (i32, i32, i32) {
    %c0_i32 = arith.constant 0 : i32
    %c0_i32_0 = arith.constant 0 : i32
    %c0_i32_1 = arith.constant 0 : i32
    %c0_i32_2 = arith.constant 0 : i32
    return %c0_i32, %c0_i32_0, %c0_i32_1 : i32, i32, i32
  }
  func.func @transform_4(%arg0: i32) -> (i32, i32) {
    %c0_i32 = arith.constant 0 : i32
    %c0_i32_0 = arith.constant 0 : i32
    %c0_i32_1 = arith.constant 0 : i32
    return %c0_i32, %c0_i32_0 : i32, i32
  }
  func.func @transform_5(%arg0: i32) -> (i32, i32, i32) {
    %c0_i32 = arith.constant 0 : i32
    %c0_i32_0 = arith.constant 0 : i32
    %c0_i32_1 = arith.constant 0 : i32
    return %arg0, %c0_i32, %c0_i32_0 : i32, i32, i32
  }
}

</mosaic_0001>

<bundles_post_ra>
// kernel: mean_pool_conv.1
= control target key start
LH: loop header
LB: loop body
LE: loop exit
PB: predicated region body
PF: predicated region fallthrough
CT: control target
= control target key end

     0   :  { %s2061_s18 = smov 0   ;;  %s2234_s0 = inlined_call_operand.vmem [shape: f32[2,4,256], index: 0, kind: input, shape index: {}]   ;;  %s2235_s1 = inlined_call_operand.vmem [shape: f32[16,8], index: 1, kind: input, shape index: {}]   ;;  %s2236_s2 = inlined_call_operand.vmem [shape: f32[9,8,4], index: 2, kind: input, shape index: {}]   ;;  %s2237_s3 = inlined_call_operand.vmem [shape: f32[3,1,64], index: 3, kind: input, shape index: {}]   ;;  %s2238_s4 = inlined_call_operand.vmem [shape: f32[8,1], index: 4, kind: input, shape index: {}]   ;;  %s2239_s5 = inlined_call_operand.vmem [shape: f32[2,8,64], index: 5, kind: output, shape index: {}]  }
   0x1 LB: > { %s1742_s19 = sadd.s32 4294967295, %s2001_s18   ;;  %p1746_p0 = scmp.ge.s32.totalorder %s2001_s18, 1  ;;  %s2001_s18 = sphi %s2061_s18, %s15_s18  }
   0x2   : > { %p187_p1 = scmp.lt.s32.totalorder %s2001_s18, 3 }
   0x4   : > { %p188_p2 = pnand %p1746_p0, %p187_p1 }
   0x5   : > { %p214_p3 = scmp.lt.s32.totalorder (!%p188_p2), %s1742_s19, 1  ;;  %s2003_s24 = smov (!%p188_p2), 112   ;;  %v225_v4 = vld [vmem:[%s2235_s1] sm:$0xff] (!%p188_p2)  ;;  %v226_v5 = vld [vmem:[%s2235_s1 + $0x8] sm:$0xff] (!%p188_p2)  ;;  %v2004_v6 = vmov (!%p188_p2), 0.0|0.0   ;;  %vm2005_vm0 = vmmov (!%p188_p2), 0  }
   0x6   : > { %191 = sbr.rel (%p188_p2) target bundleno = 948 (0x3b4), region = 40  ;;  %1933 = vmatprep.subr.bf16.mxu0 (!%p188_p2), %v2004_v6  ;;  %v2092_v7 = vpack.c.bf16 (!%p188_p2), %v226_v5, %v225_v4  ;;  %1936 = vmatprep.subr.bf16.mxu1 (!%p188_p2), %v2004_v6  ;;  %v2006_v10 = vmov (!%p188_p2), 0.0   ;;  %s2007_s29 = smov (!%p188_p2), 96   ;;  %vm233_vm1 = vcmask (!%p188_p2), 130048   ;;  %vm223_vm2 = vcmask (!%p188_p2), 666624  }
   0x7   : > { %1836 = vmatprep.mubr.msk.f32.mxu0 (!%p188_p2), %vm2005_vm0, %v2006_v10  ;;  %1843 = vmatprep.mubr.msk.f32.mxu1 (!%p188_p2), %vm2005_vm0, %v2006_v10  ;;  %s2008_s30 = smov (!%p188_p2), 64   ;;  %s2009_s6 = smov (!%p188_p2), 32   ;;  %224 = vst.msk [vmem:[#allocation2] sm:$0xf] (!%p188_p2), %vm223_vm2, %v2006_v10  ;;  %vm311_vm3 = vcmask (!%p188_p2), 134216   ;;  %vm398_vm4 = vcmask (!%p188_p2), 199816  }
   0x8   : > { %1935 = vmatpush3.bf16.msra.mxu0 (!%p188_p2), %v2092_v7  ;;  %1938 = vmatpush3.bf16.msra.mxu1 (!%p188_p2), %v2092_v7  ;;  %s2010_s7 = smov (!%p188_p2), 9   ;;  %s2011_s8 = smov (!%p188_p2), 17   ;;  %v1758_v51 = vld [vmem:[%s2237_s3] ss:$0 sm:$0xff] (!%p188_p2)  ;;  %v1765_v53 = vld [vmem:[%s2237_s3 + $0x2] ss:$0 sm:$0xff] (!%p188_p2) }
   0x9   : > { %1939 = vmatprep.subr.bf16.mxu0 (!%p188_p2), %v2004_v6  ;;  %1942 = vmatprep.subr.bf16.mxu1 (!%p188_p2), %v2004_v6  ;;  %s2012_s9 = smov (!%p188_p2), 25   ;;  %s2013_s10 = smov (!%p188_p2), 33   ;;  %vm485_vm5 = vcmask (!%p188_p2), 265416   ;;  %vm572_vm6 = vcmask (!%p188_p2), 331016   ;;  %vm657_vm7 = vcmask (!%p188_p2), 396616   ;;  %vm744_vm8 = vcmask (!%p188_p2), 462216  }
   0xa   : > { %s2014_s11 = smov (!%p188_p2), 49   ;;  %s2015_s12 = smov (!%p188_p2), 41   ;;  %vm831_vm9 = vcmask (!%p188_p2), 527816   ;;  %vm918_vm10 = vcmask (!%p188_p2), 593416   ;;  %vm939_vm11 = vcmask (!%p188_p2), 1043456   ;;  %vm935_vm12 = vcmask (!%p188_p2), 31744  }
   0xb   : > { %s2016_s13 = smov (!%p188_p2), 65   ;;  %s2017_s16 = smov (!%p188_p2), 57   ;;  %vm1687_vm13 = vcmask (!%p188_p2), 523264  }
   0xc   : > { %s2018_s22 = smov (!%p188_p2), 8   ;;  %s2020_s25 = smov (!%p188_p2), 16  }
   0xd   : > { %s2241_s19 = smov (!%p214_p3, %s1742_s19), 1  ;;  %s2021_s26 = smov 10  }
   0xe   : > { %s1789_s20 = sshll.u32 %s2241_s19, 3  ;;  %s2022_s27 = smov 18  }
   0xf   : > { %s2077_s23 = scalar_lea.vmem %s2234_s0, %s1789_s20  ;;  %s2023_s28 = smov 127  }
  0x10   : > { %v313_v0 = vld [vmem:[%s2077_s23] sm:$0xf]  ;;  %v659_v3 = vld [vmem:[%s2077_s23 + $0x4] sm:$0xf] }
  0x11   : > { %v487_v1 = vld [vmem:[%s2077_s23] sm:$0xf]  ;;  %315 = vrot.lane.b32.xlu0 %v313_v0, %s2003_s24  ;;  %v833_v8 = vld [vmem:[%s2077_s23 + $0x4] sm:$0xf] }
  0x12   : > { %489 = vrot.lane.b32.xlu1 %v487_v1, %s2003_s24  ;;  %v400_v2 = vld [vmem:[%s2077_s23] sm:$0xf]  ;;  %v746_v9 = vld [vmem:[%s2077_s23 + $0x4] sm:$0xf] }
  0x13   : > { %v227_v11 = vld [vmem:[%s2077_s23] sm:$0xf]  ;;  %v574_v20 = vld [vmem:[%s2077_s23 + $0x4] sm:$0xf]  ;;  %s2019_s23 = smov 2  }
  0x15   : > { %402 = vrot.lane.b32.xlu0 %v400_v2, %s2003_s24 }
  0x16   : > { %661 = vrot.lane.b32.xlu1 %v659_v3, %s2003_s24 }
  0x19   : > { %748 = vrot.lane.b32.xlu0 %v746_v9, %s2003_s24 }
  0x1a   : > { %835 = vrot.lane.b32.xlu1 %v833_v8, %s2003_s24 }
  0x1d   : > { %229 = vrot.lane.b32.xlu0 %v227_v11, %s2003_s24 }
  0x83   : > { %v316_v12 = vpop.permute.xlu0 %315 }
  0x84   : > { %v490_v13 = vpop.permute.xlu1 %489  ;;  %v318_v14 = vadd.f32 %v316_v12, %v313_v0  ;;  %v1680_v12 = vld [vmem:[%s2238_s4] sm:$0xff] }
  0x85   : > { %v492_v15 = vadd.f32 %v490_v13, %v487_v1  ;;  %v1759_v13 = vld [vmem:[%s2236_s2 + $0x8] sm:$0xff] }
  0x86   : > { %320 = vrot.lane.b32.xlu1 %v318_v14, %s2007_s29 }
  0x87   : > { %v403_v16 = vpop.permute.xlu0 %402 }
  0x88   : > { %v662_v17 = vpop.permute.xlu1 %661  ;;  %v405_v18 = vadd.f32 %v403_v16, %v400_v2  ;;  %v1766_v16 = vld [vmem:[%s2236_s2 + $0x10] sm:$0xff] }
  0x89   : > { %v664_v19 = vadd.f32 %v662_v17, %v659_v3  ;;  %v929_v3 = vld [vmem:[%s2236_s2] sm:$0xff] }
  0x8a   : > { %407 = vrot.lane.b32.xlu0 %v405_v18, %s2008_s30  ;;  %494 = vrot.lane.b32.xlu1 %v492_v15, %s2009_s6  ;;  %v1769_v18 = vld [vmem:[%s2236_s2 + $0x18] sm:$0xff] }
  0x8b   : > { %v749_v22 = vpop.permute.xlu0 %748 }
  0x8c   : > { %v836_v21 = vpop.permute.xlu1 %835  ;;  %v751_v24 = vadd.f32 %v749_v22, %v746_v9  ;;  %v1775_v22 = vld [vmem:[%s2236_s2 + $0x28] sm:$0xff] }
  0x8d   : > { %v838_v23 = vadd.f32 %v836_v21, %v833_v8 }
  0x8e   : > { %576 = vrot.lane.b32.xlu0 %v574_v20, %s2003_s24  ;;  %666 = vrot.lane.b32.xlu1 %v664_v19, %s2007_s29  ;;  %s2024_s29 = smov 126  }
  0x8f   : > { %v230_v25 = vpop.permute.xlu0 %229 }
  0x90   : > { %v232_v26 = vadd.f32 %v230_v25, %v227_v11 }
  0x92   : > { %840 = vrot.lane.b32.xlu1 %v838_v23, %s2009_s6  ;;  %753 = vrot.lane.b32.xlu0 %v751_v24, %s2008_s30  ;;  %v1778_v24 = vld [vmem:[%s2236_s2 + $0x30] sm:$0xff] }
  0x93   : > { %1837 = vmatmul.mubr.msk.f32.vlgmr.msra.gmra.mrb[0].mxu0 %vm233_vm1, %v232_v26  ;;  %v1781_v26 = vld [vmem:[%s2236_s2 + $0x38] sm:$0xff] }
  0x94   : > { %1941 = vmatpush3.bf16.msra.mxu0 %v2092_v7  ;;  %1850 = vmatprep.mubr.msk.f32.mxu0 %vm2005_vm0, %v2006_v10 }
  0x95   : > { %1945 = vmatprep.subr.bf16.mxu0 %v2004_v6 }
  0xf8   : > { %v321_v27 = vpop.permute.xlu1 %320 }
  0xf9   : > { %1844 = vmatmul.mubr.msk.f32.vlgmr.msra.gmra.mrb[0].mxu1 %vm233_vm1, %v321_v27 }
  0xfa   : > { %1944 = vmatpush3.bf16.msra.mxu1 %v2092_v7  ;;  %1857 = vmatprep.mubr.msk.f32.mxu1 %vm2005_vm0, %v2006_v10 }
  0xfb   : > { %1948 = vmatprep.subr.bf16.mxu1 %v2004_v6 }
  0xfc   : > { %v408_v28 = vpop.permute.xlu0 %407  ;;  %v495_v29 = vpop.permute.xlu1 %494 }
  0xfd   : > { %1851 = vmatmul.mubr.msk.f32.vlgmr.msra.gmra.mrb[2].mxu0 %vm233_vm1, %v408_v28  ;;  %1858 = vmatmul.mubr.msk.f32.vlgmr.msra.gmra.mrb[2].mxu1 %vm233_vm1, %v495_v29  ;;  %v1784_v28 = vld [vmem:[%s2236_s2 + $0x40] sm:$0xff] }
  0xfe   : > { %1947 = vmatpush3.bf16.msra.mxu0 %v2092_v7  ;;  %1950 = vmatpush3.bf16.msra.mxu1 %v2092_v7 }
  0xff   : > { %1871 = vmatprep.mubr.msk.f32.mxu1 %vm2005_vm0, %v2006_v10  ;;  %1864 = vmatprep.mubr.msk.f32.mxu0 %vm2005_vm0, %v2006_v10 }
 0x100   : > { %v577_v30 = vpop.permute.xlu0 %576  ;;  %v667_v31 = vpop.permute.xlu1 %666  ;;  %1951 = vmatprep.subr.bf16.mxu0 %v2004_v6  ;;  %1954 = vmatprep.subr.bf16.mxu1 %v2004_v6  ;;  %v2026_v6 = vmov 0  }
 0x101   : > { %v579_v32 = vadd.f32 %v577_v30, %v574_v20  ;;  %1872 = vmatmul.mubr.msk.f32.vlgmr.msra.gmra.mrb[4].mxu1 %vm233_vm1, %v667_v31  ;;  %1993 = vset.pattern.permute.xlu1 %v2026_v6  ;;  %v1772_v20 = vld [vmem:[%s2236_s2 + $0x20] sm:$0xff] }
 0x102   : > { %1956 = vmatpush3.bf16.msra.mxu1 %v2092_v7  ;;  %1885 = vmatprep.mubr.msk.f32.mxu1 %vm2005_vm0, %v2006_v10 }
 0x103   : > { %1865 = vmatmul.mubr.msk.f32.vlgmr.msra.gmra.mrb[4].mxu0 %vm233_vm1, %v579_v32  ;;  %1893 = vmatprep.subr.mxu1 %v2006_v10 }
 0x104   : > { %1953 = vmatpush3.bf16.msra.mxu0 %v2092_v7  ;;  %v841_v33 = vpop.permute.xlu1 %840  ;;  %1878 = vmatprep.mubr.msk.f32.mxu0 %vm2005_vm0, %v2006_v10  ;;  %v754_v34 = vpop.permute.xlu0 %753 }
 0x105   : > { %1886 = vmatmul.mubr.msk.f32.vlgmr.msra.gmra.mrb[6].mxu1 %vm233_vm1, %v841_v33  ;;  %1888 = vmatprep.subr.mxu0 %v2006_v10 }
 0x106   : > { %1895 = vmatprep.mubr.msk.f32.mxu1 %vm2005_vm0, %v2006_v10  ;;  %1994 = vset.pattern.permute.xlu0 %v2026_v6 }
 0x107   : > { %1879 = vmatmul.mubr.msk.f32.vlgmr.msra.gmra.mrb[6].mxu0 %vm233_vm1, %v754_v34 }
 0x108   : > { %1890 = vmatprep.mubr.msk.f32.mxu0 %vm2005_vm0, %v2006_v10 }
 0x166   : > { %v303_v35 = vpop.f32.mrb[0].mxu0 }
 0x167   : > { %308 = vrot.lane.b32.xlu0 %v303_v35, %s2010_s7  ;;  %v1838_v36 = vpop.f32.mrb[1].mxu0  ;;  %s2025_s7 = smov 120  }
 0x1cc   : > { %v390_v37 = vpop.f32.mrb[0].mxu1 }
 0x1cd   : > { %395 = vrot.lane.b32.xlu1 %v390_v37, %s2011_s8  ;;  %v1845_v38 = vpop.f32.mrb[1].mxu1  ;;  %s2027_s8 = smov 119  }
 0x1d0   : > { %v477_v39 = vpop.f32.mrb[2].mxu0  ;;  %v564_v40 = vpop.f32.mrb[2].mxu1 }
 0x1d1   : > { %482 = vrot.lane.b32.xlu0 %v477_v39, %s2012_s9  ;;  %v1852_v41 = vpop.f32.mrb[3].mxu0  ;;  %v1859_v42 = vpop.f32.mrb[3].mxu1  ;;  %569 = vrot.lane.b32.xlu1 %v564_v40, %s2013_s10  ;;  %s2028_s9 = smov 118   ;;  %s2029_s10 = smov 111  }
 0x1d4   : > { %v736_v43 = vpop.f32.mrb[4].mxu1 }
 0x1d5   : > { %v1873_v44 = vpop.f32.mrb[5].mxu1  ;;  %741 = vrot.lane.b32.xlu1 %v736_v43, %s2014_s11 }
 0x1d6   : > { %v649_v45 = vpop.f32.mrb[4].mxu0 }
 0x1d7   : > { %654 = vrot.lane.b32.xlu0 %v649_v45, %s2015_s12  ;;  %v1866_v46 = vpop.f32.mrb[5].mxu0 }
 0x1d8   : > { %v910_v47 = vpop.f32.mrb[6].mxu1 }
 0x1d9   : > { %v1887_v48 = vpop.f32.mrb[7].mxu1  ;;  %915 = vrot.lane.b32.xlu1 %v910_v47, %s2016_s13  ;;  %v309_v49 = vpop.permute.xlu0 %308  ;;  %s2030_s13 = smov 110  }
 0x1da   : > { %v823_v50 = vpop.f32.mrb[6].mxu0  ;;  %312 = vst.msk [vmem:[#allocation2] sm:$0xf] %vm311_vm3, %v309_v49 }
 0x1db   : > { %828 = vrot.lane.b32.xlu0 %v823_v50, %s2017_s16  ;;  %v1880_v52 = vpop.f32.mrb[7].mxu0 }
 0x1dd   : > { %1180 = vrot.lane.b32.xlu1 %v1758_v51, %s2018_s22 }
 0x1df   : > { %1095 = vrot.lane.b32.xlu0 %v1765_v53, %s2019_s23 }
 0x1e1   : > { %1430 = vrot.lane.b32.xlu1 %v1758_v51, %s2020_s25 }
 0x1e3   : > { %1345 = vrot.lane.b32.xlu0 %v1765_v53, %s2021_s26 }
 0x1e7   : > { %1595 = vrot.lane.b32.xlu0 %v1765_v53, %s2022_s27 }
 0x23f   : > { %v396_v54 = vpop.permute.xlu1 %395 }
 0x240   : > { %399 = vst.msk [vmem:[#allocation2] sm:$0xf] %vm398_vm4, %v396_v54 }
 0x243   : > { %v483_v55 = vpop.permute.xlu0 %482  ;;  %v570_v56 = vpop.permute.xlu1 %569 }
 0x244   : > { %486 = vst.msk [vmem:[#allocation2] sm:$0xf] %vm485_vm5, %v483_v55 }
 0x245   : > { %573 = vst.msk [vmem:[#allocation2] sm:$0xf] %vm572_vm6, %v570_v56 }
 0x247   : > { %v742_v57 = vpop.permute.xlu1 %741 }
 0x249   : > { %v655_v58 = vpop.permute.xlu0 %654 }
 0x24a   : > { %658 = vst.msk [vmem:[#allocation2] sm:$0xf] %vm657_vm7, %v655_v58 }
 0x24b   : > { %745 = vst.msk [vmem:[#allocation2] sm:$0xf] %vm744_vm8, %v742_v57  ;;  %v916_v59 = vpop.permute.xlu1 %915 }
 0x24d   : > { %v829_v60 = vpop.permute.xlu0 %828 }
 0x24e   : > { %832 = vst.msk [vmem:[#allocation2] sm:$0xf] %vm831_vm9, %v829_v60 }
 0x24f   : > { %919 = vst.msk [vmem:[#allocation2] sm:$0xf] %vm918_vm10, %v916_v59  ;;  %v1181_v63 = vpop.permute.xlu1 %1180 }
 0x251   : > { %v1096_v61 = vpop.permute.xlu0 %1095 }
 0x253   : > { %v1431_v5 = vpop.permute.xlu1 %1430 }
 0x255   : > { %v1346_v4 = vpop.permute.xlu0 %1345 }
 0x256   : > { %v920_v62 = vld [vmem:[#allocation2] sm:$0xf] }
 0x257   : > { %v1098_v0 = vmul.f32 %v1096_v61, %v920_v62  ;;  %933 = vrot.lane.b32.xlu1 %v920_v62, %s2023_s28  ;;  %v928_v1 = vmul.f32 %v1758_v51, %v920_v62  ;;  %v1183_v2 = vmul.f32 %v1181_v63, %v920_v62  ;;  %v1348_v7 = vmul.f32 %v1346_v4, %v920_v62 }
 0x258   : > { %v1433_v8 = vmul.f32 %v1431_v5, %v920_v62 }
 0x259   : > { %1102 = vrot.lane.b32.xlu0 %v1098_v0, %s2024_s29  ;;  %1894 = vmatpush3.msk.msra.mxu1 %vm939_vm11, %v928_v1  ;;  %v1596_v9 = vpop.permute.xlu0 %1595 }
 0x25a   : > { %1903 = vmatprep.subr.mxu1 %v2006_v10  ;;  %1896 = vmatmul.mubr.msk.f32.vlgmr.msra.gmra.mrb[8].mxu1 %vm935_vm12, %v929_v3  ;;  %v1598_v11 = vmul.f32 %v1596_v9, %v920_v62 }
 0x25b   : > { %1187 = vrot.lane.b32.xlu1 %v1183_v2, %s2025_s7  ;;  %1905 = vmatprep.mubr.msk.f32.mxu1 %vm2005_vm0, %v2006_v10 }
 0x25d   : > { %1267 = vrot.lane.b32.xlu0 %v920_v62, %s2027_s8 }
 0x25f   : > { %1352 = vrot.lane.b32.xlu1 %v1348_v7, %s2028_s9 }
 0x261   : > { %1437 = vrot.lane.b32.xlu0 %v1433_v8, %s2003_s24 }
 0x263   : > { %1517 = vrot.lane.b32.xlu1 %v920_v62, %s2029_s10  ;;  %s222_s10 = scalar_lea.vmem %s2239_s5, %s1789_s20 }
 0x265   : > { %1602 = vrot.lane.b32.xlu0 %v1598_v11, %s2030_s13 }
 0x267   : > { %1683 = vperm.xlu1 %1993, %v1680_v12  }
 0x2c9   : > { %v934_v14 = vpop.permute.xlu1 %933 }
 0x2ca   : > { %1889 = vmatpush3.msk.msra.mxu0 %vm939_vm11, %v934_v14 }
 0x2cb   : > { %1898 = vmatprep.subr.mxu0 %v2006_v10  ;;  %v1103_v15 = vpop.permute.xlu0 %1102  ;;  %1891 = vmatmul.mubr.msk.f32.vlgmr.msra.gmra.mrb[8].mxu0 %vm935_vm12, %v1759_v13 }
 0x2cc   : > { %1899 = vmatpush3.msk.msra.mxu0 %vm939_vm11, %v1103_v15  ;;  %1900 = vmatprep.mubr.msk.f32.mxu0 %vm2005_vm0, %v2006_v10 }
 0x2cd   : > { %v1188_v17 = vpop.permute.xlu1 %1187  ;;  %1908 = vmatprep.subr.mxu0 %v2006_v10 }
 0x2ce   : > { %1904 = vmatpush3.msk.msra.mxu1 %vm939_vm11, %v1188_v17 }
 0x2cf   : > { %v1268_v19 = vpop.permute.xlu0 %1267  ;;  %1901 = vmatmul.mubr.msk.f32.vlgmr.msra.gmra.mrb[10].mxu0 %vm935_vm12, %v1766_v16  ;;  %1913 = vmatprep.subr.mxu1 %v2006_v10 }
 0x2d0   : > { %1909 = vmatpush3.msk.msra.mxu0 %vm939_vm11, %v1268_v19  ;;  %1906 = vmatmul.mubr.msk.f32.vlgmr.msra.gmra.mrb[10].mxu1 %vm935_vm12, %v1769_v18 }
 0x2d1   : > { %v1353_v21 = vpop.permute.xlu1 %1352  ;;  %1910 = vmatprep.mubr.msk.f32.mxu0 %vm2005_vm0, %v2006_v10  ;;  %1918 = vmatprep.subr.mxu0 %v2006_v10 }
 0x2d2   : > { %1914 = vmatpush3.msk.msra.mxu1 %vm939_vm11, %v1353_v21  ;;  %1915 = vmatprep.mubr.msk.f32.mxu1 %vm2005_vm0, %v2006_v10 }
 0x2d3   : > { %v1438_v23 = vpop.permute.xlu0 %1437  ;;  %1911 = vmatmul.mubr.msk.f32.vlgmr.msra.gmra.mrb[12].mxu0 %vm935_vm12, %v1772_v20  ;;  %1923 = vmatprep.subr.mxu1 %v2006_v10 }
 0x2d4   : > { %1919 = vmatpush3.msk.msra.mxu0 %vm939_vm11, %v1438_v23  ;;  %1916 = vmatmul.mubr.msk.f32.vlgmr.msra.gmra.mrb[12].mxu1 %vm935_vm12, %v1775_v22 }
 0x2d5   : > { %v1518_v25 = vpop.permute.xlu1 %1517  ;;  %1920 = vmatprep.mubr.msk.f32.mxu0 %vm2005_vm0, %v2006_v10  ;;  %1928 = vmatprep.subr.mxu0 %v2006_v10 }
 0x2d6   : > { %1924 = vmatpush3.msk.msra.mxu1 %vm939_vm11, %v1518_v25  ;;  %1925 = vmatprep.mubr.msk.f32.mxu1 %vm2005_vm0, %v2006_v10 }
 0x2d7   : > { %v1603_v27 = vpop.permute.xlu0 %1602  ;;  %1921 = vmatmul.mubr.msk.f32.vlgmr.msra.gmra.mrb[14].mxu0 %vm935_vm12, %v1778_v24 }
 0x2d8   : > { %1929 = vmatpush3.msk.msra.mxu0 %vm939_vm11, %v1603_v27  ;;  %1926 = vmatmul.mubr.msk.f32.vlgmr.msra.gmra.mrb[14].mxu1 %vm935_vm12, %v1781_v26 }
 0x2d9   : > { %1930 = vmatprep.mubr.msk.f32.mxu0 %vm2005_vm0, %v2006_v10 }
 0x2db   : > { %1931 = vmatmul.mubr.msk.f32.vlgmr.msra.gmra.mrb[16].mxu0 %vm935_vm12, %v1784_v28 }
 0x2e6   : > { %v1684_v52 = vpop.permute.xlu1 %1683 }
 0x32d   : > { %v1084_v29 = vpop.f32.mrb[8].mxu1 }
 0x32e   : > { %v1897_v30 = vpop.f32.mrb[9].mxu1 }
 0x39e   : > { %v1008_v31 = vpop.f32.mrb[8].mxu0 }
 0x39f   : > { %v1892_v32 = vpop.f32.mrb[9].mxu0  ;;  %v1085_v33 = vadd.f32 %v1084_v29, %v1008_v31 }
 0x3a2   : > { %v1175_v34 = vpop.f32.mrb[10].mxu0 }
 0x3a3   : > { %v1179_v35 = vadd.f32 %v1175_v34, %v1085_v33  ;;  %v1902_v36 = vpop.f32.mrb[11].mxu0  ;;  %v1260_v37 = vpop.f32.mrb[10].mxu1 }
 0x3a4   : > { %v1907_v38 = vpop.f32.mrb[11].mxu1 }
 0x3a5   : > { %v1264_v39 = vadd.f32 %v1260_v37, %v1179_v35 }
 0x3a6   : > { %v1340_v40 = vpop.f32.mrb[12].mxu0 }
 0x3a7   : > { %v1344_v41 = vadd.f32 %v1340_v40, %v1264_v39  ;;  %v1912_v42 = vpop.f32.mrb[13].mxu0  ;;  %v1425_v43 = vpop.f32.mrb[12].mxu1 }
 0x3a8   : > { %v1917_v44 = vpop.f32.mrb[13].mxu1 }
 0x3a9   : > { %v1429_v10 = vadd.f32 %v1425_v43, %v1344_v41 }
 0x3aa   : > { %v1510_v45 = vpop.f32.mrb[14].mxu0 }
 0x3ab   : > { %v1514_v46 = vadd.f32 %v1510_v45, %v1429_v10  ;;  %v1922_v47 = vpop.f32.mrb[15].mxu0  ;;  %v1590_v48 = vpop.f32.mrb[14].mxu1 }
 0x3ac   : > { %v1927_v49 = vpop.f32.mrb[15].mxu1 }
 0x3ad   : > { %v1594_v50 = vadd.f32 %v1590_v48, %v1514_v46 }
 0x3ae   : > { %v1675_v51 = vpop.f32.mrb[16].mxu0 }
 0x3af   : > { %v1679_v53 = vadd.f32 %v1675_v51, %v1594_v50  ;;  %v1932_v54 = vpop.f32.mrb[17].mxu0 }
 0x3b1   : > { %v1686_v55 = vadd.f32 %v1684_v52, %v1679_v53 }
 0x3b3   : > { %1688 = vst.msk [vmem:[%s222_s10] sm:$0xff] %vm1687_vm13, %v1686_v55 }
 0x3b4 PF: > { %s15_s18 = sadd.s32 1, %s2001_s18  }
 0x3b5   : > { %p12_p4 = scmp.ge.s32.totalorder %s15_s18, 4  }
 0x3b7   :  { %14 = sbr.rel (!%p12_p4) target bundleno = 1 (0x1), region = 79 }

</bundles_post_ra>
